<compile_context>
chip_gen: v7x
topology: tpu7x:2x2x1
jax: 0.10.0
libtpu: 0.0.40
codegen_flags: <defaults>
</compile_context>

<pallas_src>
import jax
import jax.numpy as jnp
from jax.experimental import pallas as pl
from jax.experimental.pallas import tpu as pltpu


def _fused_linear_hswishlike_kernel(x_smem, p_ref, o_ref):
    # x_smem: (K,)    f32 in SMEM (activation row, scalar-addressable)
    # p_ref : (K+1,N) f32 in VMEM (rows 0..K-1 = W^T, row K = bias)
    # o_ref : (1, N)  f32
    k_dim = p_ref.shape[0] - 1

    # VPU MAC with scalar (sreg) activation operands; bias row is the init.
    y1 = p_ref[k_dim:k_dim + 1, :]                     # (1, N) bias row
    for k in range(k_dim):                             # static unroll, K tiny
        y1 = y1 + x_smem[k] * p_ref[k:k + 1, :]

    # Folded epilogue: (y1*clip(y1,0,6)+3)/6 == y1*clip(y1,0,6)*(1/6) + 0.5
    y3 = y1 * jnp.clip(y1, 0.0, 6.0) * (1.0 / 6.0) + 0.5
    o_ref[...] = y3.astype(o_ref.dtype)


@jax.jit
def model_forward(x_vec, params):
    """x_vec: (K,) f32; params: (K+1, N) f32 (rows 0..K-1 = W^T, row K = bias)."""
    K = x_vec.shape[0]
    Kp1, N = params.shape
    cost = pl.CostEstimate(
        flops=2 * K * N + 5 * N,                   # MAC + epilogue
        transcendentals=0,
        bytes_accessed=4 * (K + Kp1 * N + N),      # x + packed params + out
    )
    return pl.pallas_call(
        _fused_linear_hswishlike_kernel,
        out_shape=jax.ShapeDtypeStruct((1, N), jnp.float32),
        in_specs=[
            pl.BlockSpec(memory_space=pltpu.MemorySpace.SMEM),  # x -> SMEM
            pl.BlockSpec((Kp1, N), lambda: (0, 0)),             # packed params
        ],
        out_specs=pl.BlockSpec((1, N), lambda: (0, 0)),
        cost_estimate=cost,
    )(x_vec, params)


def _reference(x, weight, bias):
    y1 = x @ weight.T + bias
    y2 = y1 * jnp.clip(y1, 0.0, 6.0) + 3.0
    return y2 / 6.0


if __name__ == "__main__":
    key = jax.random.PRNGKey(0)
    k_x, k_w, k_b = jax.random.split(key, 3)

    # Input matching the PyTorch module: x1 = torch.randn(1, 3)
    x1 = jax.random.normal(k_x, (1, 3), dtype=jnp.float32)

    # Deterministic Linear(3, 3) params (torch-like uniform(-1/sqrt(3), 1/sqrt(3)));
    # torch layout: weight is (out_features, in_features).
    bound = 1.0 / jnp.sqrt(3.0)
    weight = jax.random.uniform(k_w, (3, 3), jnp.float32, -bound, bound)
    bias = jax.random.uniform(k_b, (3,), jnp.float32, -bound, bound)

    # One-time parameter prep (init-time, outside the per-call path):
    # pack W^T and bias into a single (K+1, N) operand -> one DMA instead of two.
    params = jnp.concatenate([weight.T, bias.reshape(1, 3)], axis=0)  # (4, 3)
    x_vec = x1.reshape(-1)                                            # (3,)

    out = model_forward(x_vec, params)
    out = jax.block_until_ready(out)

    ref = _reference(x1, weight, bias)
    assert out.shape == (1, 3)
    assert jnp.allclose(out, ref, atol=1e-5, rtol=1e-5)

    print("KERNEL_OK")
</pallas_src>

<mosaic_0001>
module attributes {stable_mosaic.version = 11 : i64} {
  func.func @_fused_linear_hswishlike_kernel(%arg0: memref<3xf32, #tpu.memory_space<smem>>, %arg1: memref<4x3xf32, #tpu.memory_space<vmem>>, %arg2: memref<1x3xf32, #tpu.memory_space<vmem>>) attributes {dimension_semantics = [], scalar_prefetch = 0 : i64, scratch_operands = 0 : i64, tpu.core_type = #tpu.core_type<tc>} {
    %c3 = arith.constant 3 : index
    %c0 = arith.constant 0 : index
    %0 = vector.load %arg1[%c3, %c0] : memref<4x3xf32, #tpu.memory_space<vmem>>, vector<1x3xf32>
    %c0_0 = arith.constant 0 : index
    %1 = memref.load %arg0[%c0_0] : memref<3xf32, #tpu.memory_space<smem>>
    %c0_1 = arith.constant 0 : index
    %c0_2 = arith.constant 0 : index
    %2 = vector.load %arg1[%c0_1, %c0_2] : memref<4x3xf32, #tpu.memory_space<vmem>>, vector<1x3xf32>
    %3 = vector.broadcast %1 : f32 to vector<1x3xf32>
    %4 = arith.mulf %3, %2 : vector<1x3xf32>
    %5 = arith.addf %0, %4 : vector<1x3xf32>
    %c1 = arith.constant 1 : index
    %6 = memref.load %arg0[%c1] : memref<3xf32, #tpu.memory_space<smem>>
    %c1_3 = arith.constant 1 : index
    %c0_4 = arith.constant 0 : index
    %7 = vector.load %arg1[%c1_3, %c0_4] : memref<4x3xf32, #tpu.memory_space<vmem>>, vector<1x3xf32>
    %8 = vector.broadcast %6 : f32 to vector<1x3xf32>
    %9 = arith.mulf %8, %7 : vector<1x3xf32>
    %10 = arith.addf %5, %9 : vector<1x3xf32>
    %c2 = arith.constant 2 : index
    %11 = memref.load %arg0[%c2] : memref<3xf32, #tpu.memory_space<smem>>
    %c2_5 = arith.constant 2 : index
    %c0_6 = arith.constant 0 : index
    %12 = vector.load %arg1[%c2_5, %c0_6] : memref<4x3xf32, #tpu.memory_space<vmem>>, vector<1x3xf32>
    %13 = vector.broadcast %11 : f32 to vector<1x3xf32>
    %14 = arith.mulf %13, %12 : vector<1x3xf32>
    %15 = arith.addf %10, %14 : vector<1x3xf32>
    %cst = arith.constant 0.000000e+00 : f32
    %cst_7 = arith.constant 6.000000e+00 : f32
    %16 = vector.broadcast %cst : f32 to vector<1x3xf32>
    %17 = arith.maximumf %16, %15 : vector<1x3xf32>
    %18 = vector.broadcast %cst_7 : f32 to vector<1x3xf32>
    %19 = arith.minimumf %18, %17 : vector<1x3xf32>
    %20 = arith.mulf %15, %19 : vector<1x3xf32>
    %cst_8 = arith.constant 0.166666672 : f32
    %21 = vector.broadcast %cst_8 : f32 to vector<1x3xf32>
    %22 = arith.mulf %20, %21 : vector<1x3xf32>
    %cst_9 = arith.constant 5.000000e-01 : f32
    %23 = vector.broadcast %cst_9 : f32 to vector<1x3xf32>
    %24 = arith.addf %22, %23 : vector<1x3xf32>
    %c0_10 = arith.constant 0 : index
    %c0_11 = arith.constant 0 : index
    %25 = vector.load %arg2[%c0_10, %c0_11] : memref<1x3xf32, #tpu.memory_space<vmem>>, vector<1x3xf32>
    tpu.vector_store %arg2[%c0_10, %c0_11], %24 {strides = array<i32>} : memref<1x3xf32, #tpu.memory_space<vmem>>, vector<1x3xf32>,
    return
  }
}

</mosaic_0001>

<bundles_post_ra>
// kernel: model_forward.1
= control target key start
LH: loop header
LB: loop body
LE: loop exit
PB: predicated region body
PF: predicated region fallthrough
CT: control target
= control target key end

     0   :  { %7 = vsyncpa [#allocation5], 0  ;;  %s193_s0 = inlined_call_operand.hbm [shape: f32[3], index: 0, kind: input, shape index: {}]   ;;  %s194_s1 = inlined_call_operand.hbm [shape: f32[4,3], index: 1, kind: input, shape index: {}]   ;;  %s195_s2 = inlined_call_operand.hbm [shape: f32[1,3], index: 2, kind: output, shape index: {}]  }
   0x1   :  { %8 = vsyncpa [#allocation3], 0 }
   0x2   :  { %9 = vsyncpa [#allocation4], 0  ;;  %s79_s11 = scalar_lea.hbm %s193_s0, 16 }
   0x3   :  { %p80_p0 = scmp.ne.s32.totalorder %s193_s0, %s79_s11  ;;  %p83_p1 = scmp.lt.u32.totalorder %s79_s11, %s193_s0 }
   0x5   :  { %p85_p2 = pnand %p83_p1, %p80_p0 }
   0x7   :  { %88 = shalt.err (!%p85_p2)
}
   0x8   :  { %s139_s16 = smov [#allocation2]   ;;  %s140_s19 = smov [#allocation6]  }
   0x9   :  { %17 = dma.hbm_to_smem %s193_s0, 16, %s139_s16, [#allocation5]  }
   0xa   :  { %s24_s20 = sshll.u32 %s140_s19, 4  ;;  %s89_s23 = scalar_lea.hbm %s194_s1, 64  ;;  %s25_s20 = int_to_ptr.vmem [resolvable:$true] %s24_s20 }
   0xb   :  { %p90_p3 = scmp.ne.s32.totalorder %s194_s1, %s89_s23  ;;  %p93_p4 = scmp.lt.u32.totalorder %s89_s23, %s194_s1 }
   0xd   :  { %p95_p5 = pnand %p93_p4, %p90_p3 }
   0xf   :  { %98 = shalt.err (!%p95_p5)
}
  0x10   :  { %s99_s28 = scalar_lea.vmem %s25_s20, 64  ;;  %p104_p7 = scmp.lt.s32.totalorder %s25_s20, %s25_s20 }
  0x11   :  { %p100_p6 = scmp.ne.s32.totalorder %s25_s20, %s99_s28  ;;  %p105_p8 = scmp.lt.s32.totalorder %s99_s28, %s99_s28 }
  0x13   :  { %p106_p9 = por %p105_p8, %p104_p7 }
  0x15   :  { %p107_p10 = pnand %p106_p9, %p100_p6 }
  0x17   :  { %110 = shalt.err (!%p107_p10)
}
  0x18   :  { %27 = dma.hbm_to_vmem [thread:$0]  %s194_s1, 64, %s25_s20, [#allocation3]  }
  0x19   :  { %133 = dma.done.wait [#allocation5], 16  }
  0x1a   :  { %134 = vsyncadd [#allocation5], 4294967280 }
  0x1b   :  { %135 = dma.done.wait [#allocation3], 64  }
  0x1c   :  { %136 = vsyncadd [#allocation3], 4294967232 }
  0x1d   :  { %34 = sfence }
  0x1e   :  { %s36_s30 = sld [smem:[#allocation2]]  ;;  %s74_s3 = sld [smem:[#allocation2 + $0x1]]  ;;  %v37_v0 = vld [vmem:[#allocation6] sm:$0x1]  ;;  %v42_v1 = vld [vmem:[#allocation6 + $0x1] sm:$0x1] }
  0x1f   :  { %s75_s4 = sld [smem:[#allocation2 + $0x2]]  ;;  %v35_v2 = vld [vmem:[#allocation6 + $0x3] sm:$0x1]  ;;  %v47_v4 = vld [vmem:[#allocation6 + $0x2] sm:$0x1]  ;;  %s141_s1 = smov [#allocation7]  }
  0x20   :  { %s64_s5 = sshll.u32 %s141_s1, 4  ;;  %vm56_vm0 = vcmask 16384   ;;  %s65_s5 = int_to_ptr.vmem [resolvable:$true] %s64_s5 }
  0x21   :  { %s111_s6 = scalar_lea.vmem %s65_s5, 16  ;;  %s115_s7 = scalar_lea.vmem %s65_s5, 32 }
  0x22   :  { %p112_p11 = scmp.ne.s32.totalorder %s65_s5, %s111_s6  ;;  %p116_p12 = scmp.lt.s32.totalorder %s65_s5, %s65_s5 }
  0x23   :  { %p117_p13 = scmp.lt.s32.totalorder %s115_s7, %s111_s6 }
  0x24   :  { %v38_v3 = vstv %s36_s30  ;;  %v43_v6 = vstv %s74_s3 }
  0x25   :  { %v39_v5 = vmul.f32 %v38_v3, %v37_v0  ;;  %v48_v7 = vstv %s75_s4  ;;  %v44_v8 = vmul.f32 %v43_v6, %v42_v1  ;;  %p118_p0 = por %p117_p13, %p116_p12 }
  0x26   :  { %v49_v10 = vmul.f32 %v48_v7, %v47_v4 }
  0x27   :  { %v40_v9 = vadd.f32 %v39_v5, %v35_v2  ;;  %p119_p1 = pnand %p118_p0, %p112_p11 }
  0x29   :  { %v45_v11 = vadd.f32 %v44_v8, %v40_v9 }
  0x2b   :  { %v50_v12 = vadd.f32 %v49_v10, %v45_v11 }
  0x2d   :  { %v51_v13 = vmax.f32 %v50_v12, 0.0 }
  0x2f   :  { %v52_v14 = vmin.f32 %v51_v13, 6.0 }
  0x31   :  { %v53_v15 = vmul.f32 %v52_v14, %v50_v12 }
  0x33   :  { %v54_v16 = vmul.f32 0.16666667, %v53_v15 }
  0x35   :  { %v55_v17 = vadd.f32 0.5, %v54_v16 }
  0x37   :  { %57 = vst.msk [vmem:[#allocation7] sm:$0x1] %vm56_vm0, %v55_v17 }
  0x38   :  { %122 = shalt.err (!%p119_p1)
}
  0x39   :  { %s123_s10 = scalar_lea.hbm %s195_s2, 16 }
  0x3a   :  { %p124_p2 = scmp.ne.s32.totalorder %s195_s2, %s123_s10  ;;  %p127_p3 = scmp.lt.u32.totalorder %s123_s10, %s195_s2 }
  0x3c   :  { %p129_p4 = pnand %p127_p3, %p124_p2 }
  0x3e   :  { %132 = shalt.err (!%p129_p4)
}
  0x3f   :  { %67 = dma.vmem_to_hbm [thread:$0]  %s65_s5, 16, %s195_s2, [#allocation4]  }
  0x40   :  { %137 = dma.done.wait [#allocation4], 16  }
  0x41   :  { %138 = vsyncadd [#allocation4], 4294967280 }
  0x42   :  { %71 = vsyncpa [#allocation3], 1 }
  0x43   :  { %72 = vsyncpa [#allocation4], 1 }
  0x44   :  { %73 = vsyncpa [#allocation5], 1 }

</bundles_post_ra>
